<compile_context>
chip_gen: v6e
topology: v6e:2x2x1
jax: 0.10.0
libtpu: 0.0.40
codegen_flags: <defaults>
</compile_context>

<pallas_src>
import jax
import jax.numpy as jnp
from jax.experimental import pallas as pl
from jax.experimental.pallas import tpu as pltpu


def _mask_kernel(w_ref, x_ref, o_ref):
    # w_ref: (1,) f32 scalar in SMEM; x_ref / o_ref: (tile_m, lanes) VMEM tiles.
    # Matches torch promotion for a 0-dim float Parameter times a float tensor:
    # the scalar is converted to x's dtype and the result keeps x's dtype.
    o_ref[...] = w_ref[0].astype(x_ref.dtype) * x_ref[...]


_LANE_WIDTHS = (4096, 2048, 1024, 512, 256, 128)


def _choose_lanes(total):
    # Widest lane-dense width (multiple of 128) that exactly divides `total`.
    for lanes in _LANE_WIDTHS:
        if total % lanes == 0:
            return lanes
    return None


def _sublane_multiple(dtype):
    # Sub-32-bit dtypes pack along sublanes: 8 rows (f32), 16 (bf16/f16), 32 (int8/fp8).
    return max(8, 32 // jnp.dtype(dtype).itemsize)


def _pick_tile_m(M, lanes, itemsize, sub, target_block_bytes):
    bytes_per_row = lanes * itemsize
    total_bytes = M * bytes_per_row

    # Small arrays: a single full-extent block (one grid step) is cheapest.
    if total_bytes <= (4 << 20):
        return M

    rows = max(sub, (target_block_bytes // bytes_per_row) // sub * sub)
    if rows >= M:
        # Array fits in one block but is big enough that we want >= 2 grid
        # steps so ("parallel",) can shard across both v7x TensorCores.
        half = -(-M // 2)
        return min(M, ((half + sub - 1) // sub) * sub)

    # Prefer a tile that divides M exactly: keeps the last block's stores
    # unmasked (lane/sublane-dense vst instead of vst.msk). Bounded search.
    probe = rows
    for _ in range(64):
        if probe < sub:
            break
        if M % probe == 0:
            return probe
        probe -= sub
    return rows


def _run_pallas(x2d, w1, *, target_block_bytes):
    M, lanes = x2d.shape
    itemsize = jnp.dtype(x2d.dtype).itemsize
    sub = _sublane_multiple(x2d.dtype)
    tile_m = _pick_tile_m(M, lanes, itemsize, sub, target_block_bytes)
    grid = (pl.cdiv(M, tile_m),)
    n = M * lanes

    return pl.pallas_call(
        _mask_kernel,
        out_shape=jax.ShapeDtypeStruct((M, lanes), x2d.dtype),
        grid_spec=pltpu.PrefetchScalarGridSpec(
            num_scalar_prefetch=0,
            grid=grid,
            in_specs=[
                # 1-D (1,) scalar in SMEM (a 2-D (1,1) block would pad to an
                # (8,128)-word SMEM tile).
                pl.BlockSpec((1,), lambda i: (0,),
                             memory_space=pltpu.MemorySpace.SMEM),
                pl.BlockSpec((tile_m, lanes), lambda i: (i, 0)),
            ],
            out_specs=pl.BlockSpec((tile_m, lanes), lambda i: (i, 0)),
        ),
        compiler_params=pltpu.CompilerParams(
            # Shards grid steps across v7x's two TensorCores; no-op on 1-TC chips.
            dimension_semantics=("parallel",),
            # Double-buffered in + out at ~6 MiB blocks = ~24 MiB; explicit
            # limit keeps us inside physical VMEM on every generation
            # (v5e/v6e: 128 MiB, v7x: 64 MiB) while exceeding the scoped defaults.
            vmem_limit_bytes=48 << 20,
        ),
        cost_estimate=pl.CostEstimate(
            flops=n, transcendentals=0, bytes_accessed=2 * n * itemsize),
    )(w1, x2d)


def mask_forward(x, weight, size=None, *, target_block_bytes=6 << 20):
    """Scalar mask: returns weight * x with x's shape/dtype preserved."""
    if size is not None and tuple(size) != tuple(x.shape):
        print("The shape of input does not match that of the mask.")

    orig_shape = x.shape
    orig_dtype = x.dtype
    total = x.size
    if total == 0:
        return x

    w1 = jnp.asarray(weight, dtype=jnp.float32).reshape(1)
    x_flat = jnp.ravel(x)

    lanes = _choose_lanes(total)
    if lanes is not None:
        # Common case: zero-copy lane-dense reshape, no padding, no extra traffic.
        out2d = _run_pallas(x_flat.reshape(total // lanes, lanes), w1,
                            target_block_bytes=target_block_bytes)
        return out2d.reshape(orig_shape)

    # Ragged element count: run the kernel on the 128-aligned prefix and handle
    # the (<128-element) tail with plain jnp — avoids a full-tensor pad + slice
    # round-trip, which would roughly triple HBM traffic for this mem-bound op.
    bulk = (total // 128) * 128
    w_tail = w1[0].astype(orig_dtype)
    if bulk == 0:
        # TODO(synk): tiny (<128-element) inputs skip the Pallas kernel entirely.
        return (w_tail * x_flat).reshape(orig_shape)
    lanes = _choose_lanes(bulk)
    head = _run_pallas(x_flat[:bulk].reshape(bulk // lanes, lanes), w1,
                       target_block_bytes=target_block_bytes)
    tail = w_tail * x_flat[bulk:]
    return jnp.concatenate([head.reshape(-1), tail]).reshape(orig_shape)


class MaskPallas:
    """JAX/Pallas equivalent of the PyTorch Mask module (mode == 'scalar')."""

    def __init__(self, mode="scalar", value=None, size=None):
        if mode != "scalar":
            raise ValueError(f"Unsupported mask mode: {mode}")
        self.mode = mode
        # nn.Parameter(torch.tensor(value if value is not None else 1)).
        # TODO(synk): torch's default (value=None) parameter is an int64 scalar;
        # here the weight is always stored as float32.
        self.weight = jnp.asarray(value if value is not None else 1.0,
                                  dtype=jnp.float32)
        self.size = size

    def __call__(self, x):
        return mask_forward(x, self.weight, self.size)


if __name__ == "__main__":
    key = jax.random.PRNGKey(0)

    # Primary case: NCHW input; 2048 elements -> (1, 2048) lane-dense view.
    x = jax.random.normal(key, (2, 4, 16, 16), dtype=jnp.float32)
    mask = MaskPallas(mode="scalar", value=0.5, size=(2, 4, 16, 16))
    y = jax.block_until_ready(mask(x))
    ref = mask.weight.astype(x.dtype) * x
    assert y.shape == x.shape and y.dtype == x.dtype
    assert jnp.allclose(y, ref, atol=1e-6, rtol=1e-6)

    # Ragged case: 150 elements -> 128-aligned prefix through the kernel + jnp tail.
    x2 = jax.random.normal(jax.random.PRNGKey(1), (2, 3, 25), dtype=jnp.float32)
    mask2 = MaskPallas(mode="scalar", value=1.25)
    y2 = jax.block_until_ready(mask2(x2))
    ref2 = mask2.weight.astype(x2.dtype) * x2
    assert y2.shape == x2.shape and y2.dtype == x2.dtype
    assert jnp.allclose(y2, ref2, atol=1e-6, rtol=1e-6)

    print("KERNEL_OK")
</pallas_src>

<mosaic_0001>
module attributes {stable_mosaic.version = 11 : i64} {
  func.func @_mask_kernel(%arg0: i32, %arg1: memref<1xf32, #tpu.memory_space<smem>>, %arg2: memref<1x2048xf32, #tpu.memory_space<vmem>>, %arg3: memref<1x2048xf32, #tpu.memory_space<vmem>>) attributes {dimension_semantics = [#tpu.dimension_semantics<parallel>], iteration_bounds = array<i64: 1>, scalar_prefetch = 0 : i64, scratch_operands = 0 : i64, tpu.core_type = #tpu.core_type<tc>, window_params = [{transform_indices = @transform_0, window_bounds = array<i64: 1>}, {transform_indices = @transform_1, window_bounds = array<i64: 1, 2048>}, {transform_indices = @transform_2, window_bounds = array<i64: 1, 2048>}]} {
    %c0 = arith.constant 0 : index
    %0 = memref.load %arg1[%c0] : memref<1xf32, #tpu.memory_space<smem>>
    %c0_0 = arith.constant 0 : index
    %c0_1 = arith.constant 0 : index
    %1 = vector.load %arg2[%c0_0, %c0_1] : memref<1x2048xf32, #tpu.memory_space<vmem>>, vector<1x2048xf32>
    %2 = vector.broadcast %0 : f32 to vector<1x2048xf32>
    %3 = arith.mulf %2, %1 : vector<1x2048xf32>
    %c0_2 = arith.constant 0 : index
    %c0_3 = arith.constant 0 : index
    %4 = vector.load %arg3[%c0_2, %c0_3] : memref<1x2048xf32, #tpu.memory_space<vmem>>, vector<1x2048xf32>
    tpu.vector_store %arg3[%c0_2, %c0_3], %3 {strides = array<i32>} : memref<1x2048xf32, #tpu.memory_space<vmem>>, vector<1x2048xf32>,
    return
  }
  func.func @transform_0(%arg0: i32) -> i32 {
    %c0_i32 = arith.constant 0 : i32
    %c0_i32_0 = arith.constant 0 : i32
    return %c0_i32 : i32
  }
  func.func @transform_1(%arg0: i32) -> (i32, i32) {
    %c0_i32 = arith.constant 0 : i32
    %c0_i32_0 = arith.constant 0 : i32
    return %arg0, %c0_i32 : i32, i32
  }
  func.func @transform_2(%arg0: i32) -> (i32, i32) {
    %c0_i32 = arith.constant 0 : i32
    %c0_i32_0 = arith.constant 0 : i32
    return %arg0, %c0_i32 : i32, i32
  }
}

</mosaic_0001>

<bundles_post_ra>
// kernel: tpu_custom_call.1
= control target key start
LH: loop header
LB: loop body
LE: loop exit
PB: predicated region body
PF: predicated region fallthrough
CT: control target
= control target key end

     0   :  { %8 = vsyncpa [#allocation4], 0  ;;  %s120_s0 = inlined_call_operand.<no memory space> [shape: f32[1], index: 0, kind: input, shape index: {}]   ;;  %s121_s1 = inlined_call_operand.hbm [shape: f32[1,2048], index: 1, kind: input, shape index: {}]   ;;  %s122_s2 = inlined_call_operand.hbm [shape: f32[1,2048], index: 2, kind: output, shape index: {}]  }
   0x1   :  { %9 = vsyncpa [#allocation5], 0  ;;  %s94_s9 = smov [#allocation3]  }
   0x2   :  { %s18_s10 = sshll.u32 %s94_s9, 4  ;;  %s19_s10 = int_to_ptr.vmem [resolvable:$true] %s18_s10 }
   0x3   :  { %s58_s11 = scalar_lea.vmem %s19_s10, 256  ;;  %p63_p1 = scmp.lt.s32.totalorder %s19_s10, %s19_s10 }
   0x4   :  { %p59_p0 = scmp.ne.s32.totalorder %s19_s10, %s58_s11  ;;  %p64_p2 = scmp.lt.s32.totalorder %s58_s11, %s58_s11 }
   0x6   :  { %p65_p3 = por %p64_p2, %p63_p1 }
   0x8   :  { %p66_p4 = pnand %p65_p3, %p59_p0 }
   0xa   :  { %69 = shalt.err (!%p66_p4)
}
   0xb   :  { %21 = dma.hbm_to_vmem [thread:$0]  %s121_s1, 256, %s19_s10, [#allocation4]  }
   0xc   :  { %90 = dma.done.wait [#allocation4], 256  }
   0xd   :  { %91 = vsyncadd [#allocation4], 4294967040  ;;  %v28_v0 = vstv %s120_s0  ;;  %s95_s16 = smov [#allocation6]   ;;  %v26_v1 = vld [vmem:[#allocation3] sm:$0xff]  ;;  %v27_v2 = vld [vmem:[#allocation3 + $0x8] sm:$0xff] }
   0xe   :  { %s39_s17 = sshll.u32 %s95_s16, 4  ;;  %v29_v3 = vmul.f32 %v28_v0, %v26_v1  ;;  %v30_v4 = vmul.f32 %v28_v0, %v27_v2  ;;  %s40_s17 = int_to_ptr.vmem [resolvable:$true] %s39_s17 }
   0xf   :  { %s70_s18 = scalar_lea.vmem %s40_s17, 256  ;;  %p75_p6 = scmp.lt.s32.totalorder %s40_s17, %s40_s17 }
  0x10   :  { %31 = vst [vmem:[#allocation6] sm:$0xff] %v29_v3  ;;  %32 = vst [vmem:[#allocation6 + $0x8] sm:$0xff] %v30_v4  ;;  %p71_p5 = scmp.ne.s32.totalorder %s40_s17, %s70_s18  ;;  %p76_p7 = scmp.lt.s32.totalorder %s70_s18, %s70_s18 }
  0x12   :  { %p77_p8 = por %p76_p7, %p75_p6 }
  0x14   :  { %p78_p9 = pnand %p77_p8, %p71_p5 }
  0x16   :  { %81 = shalt.err (!%p78_p9)
}
  0x17   :  { %42 = dma.vmem_to_hbm [thread:$0]  %s40_s17, 256, %s122_s2, [#allocation5]  }
  0x18   :  { %92 = dma.done.wait [#allocation5], 256  }
  0x19   :  { %93 = vsyncadd [#allocation5], 4294967040 }
  0x1a   :  { %46 = vsyncpa [#allocation4], 1 }
  0x1b   :  { %47 = vsyncpa [#allocation5], 1 }

</bundles_post_ra>
